<compile_context>
chip_gen: v6e
topology: v6e:2x2x1
jax: 0.10.0
libtpu: 0.0.40
codegen_flags: <defaults>
</compile_context>

<pallas_src>
import math

import jax
import jax.numpy as jnp
from jax.experimental import pallas as pl
from jax.experimental.pallas import tpu as pltpu


D_PAD = 128       # lane-dense working width
_DEC2_OFF = 64    # lane offset of decoder2's outputs inside the fused decoder output


def _round_up(x, m):
    return ((x + m - 1) // m) * m


# --------------------------------- fused kernel -------------------------------------

def _make_usad_kernel(kin):
    """kin: padded contraction width (multiple of 8, <= D_PAD)."""

    def kernel(x_ref, w_ref, b_ref, out1_ref, out2_ref):
        # x_ref:    (TB, D)      zero-padded flattened windows (one batch tile)
        # w_ref:    (9, kin, D)  bf16 packed weights (resident across the grid)
        # b_ref:    (9, 1, D)    f32 packed biases   (resident across the grid)
        # out1_ref: (TB, D)      fused decoder out: ae1 in [0,n), ae2 in [OFF,OFF+n)
        # out2_ref: (TB, D)      ae2ae1 in [0,n)
        # Layer slots: 0-2 encoder, 3-5 fused decoder1+decoder2, 6-8 decoder2.

        def lin(x, i):
            w = w_ref[i].astype(jnp.float32)                       # (kin, D)
            return jnp.dot(x[:, :kin], w,
                           preferred_element_type=jnp.float32) + b_ref[i]

        def relu(x):
            return jnp.maximum(x, 0.0)

        def sigmoid(x):                                            # exact; exp -> EUP slot
            return 1.0 / (1.0 + jnp.exp(-x))

        def encoder(x):
            return relu(lin(relu(lin(relu(lin(x, 0)), 1)), 2))

        def decoder(x, base):
            return sigmoid(lin(relu(lin(relu(lin(x, base)), base + 1)), base + 2))

        x = x_ref[...]
        z = encoder(x)                       # latent in lanes [0, n_latent)
        dec12 = decoder(z, 3)                # fused dec1|dec2 (lane-block packed)
        ae2ae1 = decoder(encoder(dec12), 6)  # re-encode ae1 lanes, decode with decoder2

        out1_ref[...] = dec12                # two full-tile, unmasked, lane-dense stores
        out2_ref[...] = ae2ae1

    return kernel


# ------------------------------ wrapper / params ------------------------------------

def usad_forward_batched(g, params, tile_b=128):
    """Apply USAD's forward independently to each window in the batch.

    g: (B, n_window, feats) or (B, n).  Returns (ae1, ae2, ae2ae1), each (B, n).
    """
    n, kin, off, d = params["n"], params["kin"], params["off"], params["d"]
    B = g.shape[0]
    x = jnp.reshape(g, (B, -1)).astype(jnp.float32)

    tb = min(tile_b, _round_up(B, 8))            # batch tile (rows), multiple of 8
    b_pad = _round_up(B, tb)
    x_pad = jnp.zeros((b_pad, d), jnp.float32).at[:B, :n].set(x)   # pad once, lane-dense

    out1, out2 = pl.pallas_call(
        _make_usad_kernel(kin),
        out_shape=(jax.ShapeDtypeStruct((b_pad, d), jnp.float32),
                   jax.ShapeDtypeStruct((b_pad, d), jnp.float32)),
        grid=(b_pad // tb,),
        in_specs=[
            pl.BlockSpec((tb, d), lambda b: (b, 0)),          # activations: tiled over batch
            pl.BlockSpec((9, kin, d), lambda b: (0, 0, 0)),   # weights: DMA'd once, resident
            pl.BlockSpec((9, 1, d), lambda b: (0, 0, 0)),     # biases:  DMA'd once, resident
        ],
        out_specs=(pl.BlockSpec((tb, d), lambda b: (b, 0)),
                   pl.BlockSpec((tb, d), lambda b: (b, 0))),
        compiler_params=pltpu.CompilerParams(
            dimension_semantics=("parallel",)),               # shard batch axis across TCs
    )(x_pad, params["w_all"], params["b_all"])

    return out1[:B, :n], out1[:B, off:off + n], out2[:B, :n]


def usad_forward(g, params):
    """Exact module semantics: forward(g) with g.view(1,-1); returns three (n,) vectors."""
    ae1, ae2, ae2ae1 = usad_forward_batched(jnp.reshape(g, (1, -1)), params, tile_b=8)
    return ae1[0], ae2[0], ae2ae1[0]


def init_params(key, feats, n_window=5, n_hidden=16, n_latent=5, d=D_PAD):
    n = feats * n_window
    h, l = n_hidden, n_latent
    off = _DEC2_OFF
    assert off + n <= d, "fused decoder lane packing requires feats * n_window <= 64"
    kin = max(32, _round_up(max(n, 2 * h, l), 8))   # padded contraction width
    assert kin <= off                               # ae2 lanes stay outside the re-encode slice

    # 9 raw Linear layers, PyTorch default init U(-1/sqrt(fan_in), +1/sqrt(fan_in)).
    dims = [
        (n, h), (h, h), (h, l),     # encoder
        (l, h), (h, h), (h, n),     # decoder1
        (l, h), (h, h), (h, n),     # decoder2
    ]
    keys = jax.random.split(key, 2 * len(dims))
    raw_w, raw_b = [], []
    for i, (di, do) in enumerate(dims):
        bound = 1.0 / math.sqrt(di)
        w = jax.random.uniform(keys[2 * i], (di, do), jnp.float32, -bound, bound)
        b = jax.random.uniform(keys[2 * i + 1], (1, do), jnp.float32, -bound, bound)
        raw_w.append(w.astype(jnp.bfloat16).astype(jnp.float32))   # effective bf16 weights
        raw_b.append(b)

    # Pack into 9 lane-dense (kin, d) slabs: 0-2 encoder, 3-5 fused dec1+dec2, 6-8 dec2.
    w_all = jnp.zeros((9, kin, d), jnp.float32)
    b_all = jnp.zeros((9, 1, d), jnp.float32)

    def put(w_all, b_all, slot, idx, r0, c0):
        w, b = raw_w[idx], raw_b[idx]
        di, do = w.shape
        w_all = w_all.at[slot, r0:r0 + di, c0:c0 + do].set(w)
        b_all = b_all.at[slot, 0, c0:c0 + do].set(b[0])
        return w_all, b_all

    for slot, idx in ((0, 0), (1, 1), (2, 2)):               # encoder
        w_all, b_all = put(w_all, b_all, slot, idx, 0, 0)
    w_all, b_all = put(w_all, b_all, 3, 3, 0, 0)             # dec1 L0: z -> lanes [0,h)
    w_all, b_all = put(w_all, b_all, 3, 6, 0, h)             # dec2 L0: z -> lanes [h,2h)
    w_all, b_all = put(w_all, b_all, 4, 4, 0, 0)             # dec1 L1 (block-diagonal)
    w_all, b_all = put(w_all, b_all, 4, 7, h, h)             # dec2 L1 (block-diagonal)
    w_all, b_all = put(w_all, b_all, 5, 5, 0, 0)             # dec1 L2 -> ae1 lanes [0,n)
    w_all, b_all = put(w_all, b_all, 5, 8, h, off)           # dec2 L2 -> ae2 lanes [off,off+n)
    for slot, idx in ((6, 6), (7, 7), (8, 8)):               # decoder2 (ae2ae1 path)
        w_all, b_all = put(w_all, b_all, slot, idx, 0, 0)

    return {
        "n": n, "kin": kin, "off": off, "d": d,
        "w_all": w_all.astype(jnp.bfloat16),    # bf16 weights: half the DMA / resident VMEM
        "b_all": b_all,
        "raw_w": raw_w, "raw_b": raw_b,
    }


# ---------------------------- pure-JAX reference ------------------------------------

def usad_reference_batched(g, params):
    w, b = params["raw_w"], params["raw_b"]

    def lin(x, i):
        return x @ w[i] + b[i]

    def enc(x):
        return jax.nn.relu(lin(jax.nn.relu(lin(jax.nn.relu(lin(x, 0)), 1)), 2))

    def dec(x, base):
        return jax.nn.sigmoid(
            lin(jax.nn.relu(lin(jax.nn.relu(lin(x, base)), base + 1)), base + 2))

    x = jnp.reshape(g, (g.shape[0], -1)).astype(jnp.float32)
    z = enc(x)
    ae1 = dec(z, 3)
    ae2 = dec(z, 6)
    ae2ae1 = dec(enc(ae1), 6)
    return ae1, ae2, ae2ae1


# ------------------------------------ main -------------------------------------------

if __name__ == "__main__":
    key = jax.random.PRNGKey(0)
    pkey, gkey = jax.random.split(key)

    feats, n_window = 4, 5                # USAD fixes n_window = 5  ->  n = 20
    n = feats * n_window
    params = init_params(pkey, feats, n_window)

    B = 16                                # batch of windows
    g_batch = jax.random.normal(gkey, (B, n_window, feats), dtype=jnp.float32)

    fwd = jax.jit(lambda g: usad_forward_batched(g, params))
    ae1, ae2, ae2ae1 = fwd(g_batch)
    jax.block_until_ready((ae1, ae2, ae2ae1))

    # numerical / sanity checks against the pure-JAX reference (same bf16 weights)
    r1, r2, r3 = usad_reference_batched(g_batch, params)
    for got, want in ((ae1, r1), (ae2, r2), (ae2ae1, r3)):
        assert got.shape == (B, n)
        assert bool(jnp.all(jnp.isfinite(got)))
        assert bool(jnp.all((got >= 0.0) & (got <= 1.0)))          # sigmoid outputs
        assert bool(jnp.max(jnp.abs(got - want)) < 5e-3)

    # single-window path == exact PyTorch forward semantics (g.view(1,-1))
    s1, s2, s3 = usad_forward(g_batch[0], params)
    jax.block_until_ready((s1, s2, s3))
    assert s1.shape == (n,) and s2.shape == (n,) and s3.shape == (n,)
    assert bool(jnp.max(jnp.abs(s1 - r1[0])) < 5e-3)
    assert bool(jnp.max(jnp.abs(s2 - r2[0])) < 5e-3)
    assert bool(jnp.max(jnp.abs(s3 - r3[0])) < 5e-3)

    print("KERNEL_OK")
</pallas_src>

<mosaic_0001>
module attributes {stable_mosaic.version = 11 : i64} {
  func.func @kernel(%arg0: i32, %arg1: memref<16x128xf32, #tpu.memory_space<vmem>>, %arg2: memref<9x32x128xbf16, #tpu.memory_space<vmem>>, %arg3: memref<9x1x128xf32, #tpu.memory_space<vmem>>, %arg4: memref<16x128xf32, #tpu.memory_space<vmem>>, %arg5: memref<16x128xf32, #tpu.memory_space<vmem>>) attributes {dimension_semantics = [#tpu.dimension_semantics<parallel>], iteration_bounds = array<i64: 1>, scalar_prefetch = 0 : i64, scratch_operands = 0 : i64, tpu.core_type = #tpu.core_type<tc>, window_params = [{transform_indices = @transform_0, window_bounds = array<i64: 16, 128>}, {pipeline_mode = #tpu.pipeline_mode<synchronous>, transform_indices = @transform_1, window_bounds = array<i64: 9, 32, 128>}, {pipeline_mode = #tpu.pipeline_mode<synchronous>, transform_indices = @transform_2, window_bounds = array<i64: 9, 1, 128>}, {transform_indices = @transform_3, window_bounds = array<i64: 16, 128>}, {transform_indices = @transform_4, window_bounds = array<i64: 16, 128>}]} {
    %c0 = arith.constant 0 : index
    %c0_0 = arith.constant 0 : index
    %0 = vector.load %arg1[%c0, %c0_0] : memref<16x128xf32, #tpu.memory_space<vmem>>, vector<16x128xf32>
    %c0_1 = arith.constant 0 : index
    %c0_2 = arith.constant 0 : index
    %c0_3 = arith.constant 0 : index
    %1 = vector.load %arg2[%c0_1, %c0_2, %c0_3] : memref<9x32x128xbf16, #tpu.memory_space<vmem>>, vector<1x32x128xbf16>
    %2 = vector.shape_cast %1 : vector<1x32x128xbf16> to vector<32x128xbf16>
    %3 = arith.extf %2 : vector<32x128xbf16> to vector<32x128xf32>
    %4 = vector.extract_strided_slice %0 {offsets = [0, 0], sizes = [16, 32], strides = [1, 1]} : vector<16x128xf32> to vector<16x32xf32>
    %cst = arith.constant dense<0.000000e+00> : vector<16x128xf32>
    %5 = tpu.matmul %4, %3, %cst {dimension_numbers = #tpu.dot_dimension_numbers<[1], [0], [0], [1], [0, 0, 1, 1], [], []>} : vector<16x32xf32>, vector<32x128xf32>, vector<16x128xf32> -> vector<16x128xf32>
    %c0_4 = arith.constant 0 : index
    %c0_5 = arith.constant 0 : index
    %c0_6 = arith.constant 0 : index
    %6 = vector.load %arg3[%c0_4, %c0_5, %c0_6] : memref<9x1x128xf32, #tpu.memory_space<vmem>>, vector<1x1x128xf32>
    %7 = vector.shape_cast %6 : vector<1x1x128xf32> to vector<1x128xf32>
    %8 = vector.broadcast %7 : vector<1x128xf32> to vector<16x128xf32>
    %9 = arith.addf %5, %8 : vector<16x128xf32>
    %cst_7 = arith.constant 0.000000e+00 : f32
    %10 = vector.broadcast %cst_7 : f32 to vector<16x128xf32>
    %11 = arith.maximumf %9, %10 : vector<16x128xf32>
    %c1 = arith.constant 1 : index
    %c0_8 = arith.constant 0 : index
    %c0_9 = arith.constant 0 : index
    %12 = vector.load %arg2[%c1, %c0_8, %c0_9] : memref<9x32x128xbf16, #tpu.memory_space<vmem>>, vector<1x32x128xbf16>
    %13 = vector.shape_cast %12 : vector<1x32x128xbf16> to vector<32x128xbf16>
    %14 = arith.extf %13 : vector<32x128xbf16> to vector<32x128xf32>
    %15 = vector.extract_strided_slice %11 {offsets = [0, 0], sizes = [16, 32], strides = [1, 1]} : vector<16x128xf32> to vector<16x32xf32>
    %cst_10 = arith.constant dense<0.000000e+00> : vector<16x128xf32>
    %16 = tpu.matmul %15, %14, %cst_10 {dimension_numbers = #tpu.dot_dimension_numbers<[1], [0], [0], [1], [0, 0, 1, 1], [], []>} : vector<16x32xf32>, vector<32x128xf32>, vector<16x128xf32> -> vector<16x128xf32>
    %c1_11 = arith.constant 1 : index
    %c0_12 = arith.constant 0 : index
    %c0_13 = arith.constant 0 : index
    %17 = vector.load %arg3[%c1_11, %c0_12, %c0_13] : memref<9x1x128xf32, #tpu.memory_space<vmem>>, vector<1x1x128xf32>
    %18 = vector.shape_cast %17 : vector<1x1x128xf32> to vector<1x128xf32>
    %19 = vector.broadcast %18 : vector<1x128xf32> to vector<16x128xf32>
    %20 = arith.addf %16, %19 : vector<16x128xf32>
    %cst_14 = arith.constant 0.000000e+00 : f32
    %21 = vector.broadcast %cst_14 : f32 to vector<16x128xf32>
    %22 = arith.maximumf %20, %21 : vector<16x128xf32>
    %c2 = arith.constant 2 : index
    %c0_15 = arith.constant 0 : index
    %c0_16 = arith.constant 0 : index
    %23 = vector.load %arg2[%c2, %c0_15, %c0_16] : memref<9x32x128xbf16, #tpu.memory_space<vmem>>, vector<1x32x128xbf16>
    %24 = vector.shape_cast %23 : vector<1x32x128xbf16> to vector<32x128xbf16>
    %25 = arith.extf %24 : vector<32x128xbf16> to vector<32x128xf32>
    %26 = vector.extract_strided_slice %22 {offsets = [0, 0], sizes = [16, 32], strides = [1, 1]} : vector<16x128xf32> to vector<16x32xf32>
    %cst_17 = arith.constant dense<0.000000e+00> : vector<16x128xf32>
    %27 = tpu.matmul %26, %25, %cst_17 {dimension_numbers = #tpu.dot_dimension_numbers<[1], [0], [0], [1], [0, 0, 1, 1], [], []>} : vector<16x32xf32>, vector<32x128xf32>, vector<16x128xf32> -> vector<16x128xf32>
    %c2_18 = arith.constant 2 : index
    %c0_19 = arith.constant 0 : index
    %c0_20 = arith.constant 0 : index
    %28 = vector.load %arg3[%c2_18, %c0_19, %c0_20] : memref<9x1x128xf32, #tpu.memory_space<vmem>>, vector<1x1x128xf32>
    %29 = vector.shape_cast %28 : vector<1x1x128xf32> to vector<1x128xf32>
    %30 = vector.broadcast %29 : vector<1x128xf32> to vector<16x128xf32>
    %31 = arith.addf %27, %30 : vector<16x128xf32>
    %cst_21 = arith.constant 0.000000e+00 : f32
    %32 = vector.broadcast %cst_21 : f32 to vector<16x128xf32>
    %33 = arith.maximumf %31, %32 : vector<16x128xf32>
    %c3 = arith.constant 3 : index
    %c0_22 = arith.constant 0 : index
    %c0_23 = arith.constant 0 : index
    %34 = vector.load %arg2[%c3, %c0_22, %c0_23] : memref<9x32x128xbf16, #tpu.memory_space<vmem>>, vector<1x32x128xbf16>
    %35 = vector.shape_cast %34 : vector<1x32x128xbf16> to vector<32x128xbf16>
    %36 = arith.extf %35 : vector<32x128xbf16> to vector<32x128xf32>
    %37 = vector.extract_strided_slice %33 {offsets = [0, 0], sizes = [16, 32], strides = [1, 1]} : vector<16x128xf32> to vector<16x32xf32>
    %cst_24 = arith.constant dense<0.000000e+00> : vector<16x128xf32>
    %38 = tpu.matmul %37, %36, %cst_24 {dimension_numbers = #tpu.dot_dimension_numbers<[1], [0], [0], [1], [0, 0, 1, 1], [], []>} : vector<16x32xf32>, vector<32x128xf32>, vector<16x128xf32> -> vector<16x128xf32>
    %c3_25 = arith.constant 3 : index
    %c0_26 = arith.constant 0 : index
    %c0_27 = arith.constant 0 : index
    %39 = vector.load %arg3[%c3_25, %c0_26, %c0_27] : memref<9x1x128xf32, #tpu.memory_space<vmem>>, vector<1x1x128xf32>
    %40 = vector.shape_cast %39 : vector<1x1x128xf32> to vector<1x128xf32>
    %41 = vector.broadcast %40 : vector<1x128xf32> to vector<16x128xf32>
    %42 = arith.addf %38, %41 : vector<16x128xf32>
    %cst_28 = arith.constant 0.000000e+00 : f32
    %43 = vector.broadcast %cst_28 : f32 to vector<16x128xf32>
    %44 = arith.maximumf %42, %43 : vector<16x128xf32>
    %c4 = arith.constant 4 : index
    %c0_29 = arith.constant 0 : index
    %c0_30 = arith.constant 0 : index
    %45 = vector.load %arg2[%c4, %c0_29, %c0_30] : memref<9x32x128xbf16, #tpu.memory_space<vmem>>, vector<1x32x128xbf16>
    %46 = vector.shape_cast %45 : vector<1x32x128xbf16> to vector<32x128xbf16>
    %47 = arith.extf %46 : vector<32x128xbf16> to vector<32x128xf32>
    %48 = vector.extract_strided_slice %44 {offsets = [0, 0], sizes = [16, 32], strides = [1, 1]} : vector<16x128xf32> to vector<16x32xf32>
    %cst_31 = arith.constant dense<0.000000e+00> : vector<16x128xf32>
    %49 = tpu.matmul %48, %47, %cst_31 {dimension_numbers = #tpu.dot_dimension_numbers<[1], [0], [0], [1], [0, 0, 1, 1], [], []>} : vector<16x32xf32>, vector<32x128xf32>, vector<16x128xf32> -> vector<16x128xf32>
    %c4_32 = arith.constant 4 : index
    %c0_33 = arith.constant 0 : index
    %c0_34 = arith.constant 0 : index
    %50 = vector.load %arg3[%c4_32, %c0_33, %c0_34] : memref<9x1x128xf32, #tpu.memory_space<vmem>>, vector<1x1x128xf32>
    %51 = vector.shape_cast %50 : vector<1x1x128xf32> to vector<1x128xf32>
    %52 = vector.broadcast %51 : vector<1x128xf32> to vector<16x128xf32>
    %53 = arith.addf %49, %52 : vector<16x128xf32>
    %cst_35 = arith.constant 0.000000e+00 : f32
    %54 = vector.broadcast %cst_35 : f32 to vector<16x128xf32>
    %55 = arith.maximumf %53, %54 : vector<16x128xf32>
    %c5 = arith.constant 5 : index
    %c0_36 = arith.constant 0 : index
    %c0_37 = arith.constant 0 : index
    %56 = vector.load %arg2[%c5, %c0_36, %c0_37] : memref<9x32x128xbf16, #tpu.memory_space<vmem>>, vector<1x32x128xbf16>
    %57 = vector.shape_cast %56 : vector<1x32x128xbf16> to vector<32x128xbf16>
    %58 = arith.extf %57 : vector<32x128xbf16> to vector<32x128xf32>
    %59 = vector.extract_strided_slice %55 {offsets = [0, 0], sizes = [16, 32], strides = [1, 1]} : vector<16x128xf32> to vector<16x32xf32>
    %cst_38 = arith.constant dense<0.000000e+00> : vector<16x128xf32>
    %60 = tpu.matmul %59, %58, %cst_38 {dimension_numbers = #tpu.dot_dimension_numbers<[1], [0], [0], [1], [0, 0, 1, 1], [], []>} : vector<16x32xf32>, vector<32x128xf32>, vector<16x128xf32> -> vector<16x128xf32>
    %c5_39 = arith.constant 5 : index
    %c0_40 = arith.constant 0 : index
    %c0_41 = arith.constant 0 : index
    %61 = vector.load %arg3[%c5_39, %c0_40, %c0_41] : memref<9x1x128xf32, #tpu.memory_space<vmem>>, vector<1x1x128xf32>
    %62 = vector.shape_cast %61 : vector<1x1x128xf32> to vector<1x128xf32>
    %63 = vector.broadcast %62 : vector<1x128xf32> to vector<16x128xf32>
    %64 = arith.addf %60, %63 : vector<16x128xf32>
    %cst_42 = arith.constant 0.000000e+00 : f32
    %65 = vector.broadcast %cst_42 : f32 to vector<16x128xf32>
    %66 = arith.subf %65, %64 : vector<16x128xf32>
    %67 = math.exp %66 : vector<16x128xf32>
    %cst_43 = arith.constant 1.000000e+00 : f32
    %68 = vector.broadcast %cst_43 : f32 to vector<16x128xf32>
    %69 = arith.addf %68, %67 : vector<16x128xf32>
    %cst_44 = arith.constant 1.000000e+00 : f32
    %70 = vector.broadcast %cst_44 : f32 to vector<16x128xf32>
    %71 = arith.divf %70, %69 : vector<16x128xf32>
    %c0_45 = arith.constant 0 : index
    %c0_46 = arith.constant 0 : index
    %c0_47 = arith.constant 0 : index
    %72 = vector.load %arg2[%c0_45, %c0_46, %c0_47] : memref<9x32x128xbf16, #tpu.memory_space<vmem>>, vector<1x32x128xbf16>
    %73 = vector.shape_cast %72 : vector<1x32x128xbf16> to vector<32x128xbf16>
    %74 = arith.extf %73 : vector<32x128xbf16> to vector<32x128xf32>
    %75 = vector.extract_strided_slice %71 {offsets = [0, 0], sizes = [16, 32], strides = [1, 1]} : vector<16x128xf32> to vector<16x32xf32>
    %cst_48 = arith.constant dense<0.000000e+00> : vector<16x128xf32>
    %76 = tpu.matmul %75, %74, %cst_48 {dimension_numbers = #tpu.dot_dimension_numbers<[1], [0], [0], [1], [0, 0, 1, 1], [], []>} : vector<16x32xf32>, vector<32x128xf32>, vector<16x128xf32> -> vector<16x128xf32>
    %c0_49 = arith.constant 0 : index
    %c0_50 = arith.constant 0 : index
    %c0_51 = arith.constant 0 : index
    %77 = vector.load %arg3[%c0_49, %c0_50, %c0_51] : memref<9x1x128xf32, #tpu.memory_space<vmem>>, vector<1x1x128xf32>
    %78 = vector.shape_cast %77 : vector<1x1x128xf32> to vector<1x128xf32>
    %79 = vector.broadcast %78 : vector<1x128xf32> to vector<16x128xf32>
    %80 = arith.addf %76, %79 : vector<16x128xf32>
    %cst_52 = arith.constant 0.000000e+00 : f32
    %81 = vector.broadcast %cst_52 : f32 to vector<16x128xf32>
    %82 = arith.maximumf %80, %81 : vector<16x128xf32>
    %c1_53 = arith.constant 1 : index
    %c0_54 = arith.constant 0 : index
    %c0_55 = arith.constant 0 : index
    %83 = vector.load %arg2[%c1_53, %c0_54, %c0_55] : memref<9x32x128xbf16, #tpu.memory_space<vmem>>, vector<1x32x128xbf16>
    %84 = vector.shape_cast %83 : vector<1x32x128xbf16> to vector<32x128xbf16>
    %85 = arith.extf %84 : vector<32x128xbf16> to vector<32x128xf32>
    %86 = vector.extract_strided_slice %82 {offsets = [0, 0], sizes = [16, 32], strides = [1, 1]} : vector<16x128xf32> to vector<16x32xf32>
    %cst_56 = arith.constant dense<0.000000e+00> : vector<16x128xf32>
    %87 = tpu.matmul %86, %85, %cst_56 {dimension_numbers = #tpu.dot_dimension_numbers<[1], [0], [0], [1], [0, 0, 1, 1], [], []>} : vector<16x32xf32>, vector<32x128xf32>, vector<16x128xf32> -> vector<16x128xf32>
    %c1_57 = arith.constant 1 : index
    %c0_58 = arith.constant 0 : index
    %c0_59 = arith.constant 0 : index
    %88 = vector.load %arg3[%c1_57, %c0_58, %c0_59] : memref<9x1x128xf32, #tpu.memory_space<vmem>>, vector<1x1x128xf32>
    %89 = vector.shape_cast %88 : vector<1x1x128xf32> to vector<1x128xf32>
    %90 = vector.broadcast %89 : vector<1x128xf32> to vector<16x128xf32>
    %91 = arith.addf %87, %90 : vector<16x128xf32>
    %cst_60 = arith.constant 0.000000e+00 : f32
    %92 = vector.broadcast %cst_60 : f32 to vector<16x128xf32>
    %93 = arith.maximumf %91, %92 : vector<16x128xf32>
    %c2_61 = arith.constant 2 : index
    %c0_62 = arith.constant 0 : index
    %c0_63 = arith.constant 0 : index
    %94 = vector.load %arg2[%c2_61, %c0_62, %c0_63] : memref<9x32x128xbf16, #tpu.memory_space<vmem>>, vector<1x32x128xbf16>
    %95 = vector.shape_cast %94 : vector<1x32x128xbf16> to vector<32x128xbf16>
    %96 = arith.extf %95 : vector<32x128xbf16> to vector<32x128xf32>
    %97 = vector.extract_strided_slice %93 {offsets = [0, 0], sizes = [16, 32], strides = [1, 1]} : vector<16x128xf32> to vector<16x32xf32>
    %cst_64 = arith.constant dense<0.000000e+00> : vector<16x128xf32>
    %98 = tpu.matmul %97, %96, %cst_64 {dimension_numbers = #tpu.dot_dimension_numbers<[1], [0], [0], [1], [0, 0, 1, 1], [], []>} : vector<16x32xf32>, vector<32x128xf32>, vector<16x128xf32> -> vector<16x128xf32>
    %c2_65 = arith.constant 2 : index
    %c0_66 = arith.constant 0 : index
    %c0_67 = arith.constant 0 : index
    %99 = vector.load %arg3[%c2_65, %c0_66, %c0_67] : memref<9x1x128xf32, #tpu.memory_space<vmem>>, vector<1x1x128xf32>
    %100 = vector.shape_cast %99 : vector<1x1x128xf32> to vector<1x128xf32>
    %101 = vector.broadcast %100 : vector<1x128xf32> to vector<16x128xf32>
    %102 = arith.addf %98, %101 : vector<16x128xf32>
    %cst_68 = arith.constant 0.000000e+00 : f32
    %103 = vector.broadcast %cst_68 : f32 to vector<16x128xf32>
    %104 = arith.maximumf %102, %103 : vector<16x128xf32>
    %c6 = arith.constant 6 : index
    %c0_69 = arith.constant 0 : index
    %c0_70 = arith.constant 0 : index
    %105 = vector.load %arg2[%c6, %c0_69, %c0_70] : memref<9x32x128xbf16, #tpu.memory_space<vmem>>, vector<1x32x128xbf16>
    %106 = vector.shape_cast %105 : vector<1x32x128xbf16> to vector<32x128xbf16>
    %107 = arith.extf %106 : vector<32x128xbf16> to vector<32x128xf32>
    %108 = vector.extract_strided_slice %104 {offsets = [0, 0], sizes = [16, 32], strides = [1, 1]} : vector<16x128xf32> to vector<16x32xf32>
    %cst_71 = arith.constant dense<0.000000e+00> : vector<16x128xf32>
    %109 = tpu.matmul %108, %107, %cst_71 {dimension_numbers = #tpu.dot_dimension_numbers<[1], [0], [0], [1], [0, 0, 1, 1], [], []>} : vector<16x32xf32>, vector<32x128xf32>, vector<16x128xf32> -> vector<16x128xf32>
    %c6_72 = arith.constant 6 : index
    %c0_73 = arith.constant 0 : index
    %c0_74 = arith.constant 0 : index
    %110 = vector.load %arg3[%c6_72, %c0_73, %c0_74] : memref<9x1x128xf32, #tpu.memory_space<vmem>>, vector<1x1x128xf32>
    %111 = vector.shape_cast %110 : vector<1x1x128xf32> to vector<1x128xf32>
    %112 = vector.broadcast %111 : vector<1x128xf32> to vector<16x128xf32>
    %113 = arith.addf %109, %112 : vector<16x128xf32>
    %cst_75 = arith.constant 0.000000e+00 : f32
    %114 = vector.broadcast %cst_75 : f32 to vector<16x128xf32>
    %115 = arith.maximumf %113, %114 : vector<16x128xf32>
    %c7 = arith.constant 7 : index
    %c0_76 = arith.constant 0 : index
    %c0_77 = arith.constant 0 : index
    %116 = vector.load %arg2[%c7, %c0_76, %c0_77] : memref<9x32x128xbf16, #tpu.memory_space<vmem>>, vector<1x32x128xbf16>
    %117 = vector.shape_cast %116 : vector<1x32x128xbf16> to vector<32x128xbf16>
    %118 = arith.extf %117 : vector<32x128xbf16> to vector<32x128xf32>
    %119 = vector.extract_strided_slice %115 {offsets = [0, 0], sizes = [16, 32], strides = [1, 1]} : vector<16x128xf32> to vector<16x32xf32>
    %cst_78 = arith.constant dense<0.000000e+00> : vector<16x128xf32>
    %120 = tpu.matmul %119, %118, %cst_78 {dimension_numbers = #tpu.dot_dimension_numbers<[1], [0], [0], [1], [0, 0, 1, 1], [], []>} : vector<16x32xf32>, vector<32x128xf32>, vector<16x128xf32> -> vector<16x128xf32>
    %c7_79 = arith.constant 7 : index
    %c0_80 = arith.constant 0 : index
    %c0_81 = arith.constant 0 : index
    %121 = vector.load %arg3[%c7_79, %c0_80, %c0_81] : memref<9x1x128xf32, #tpu.memory_space<vmem>>, vector<1x1x128xf32>
    %122 = vector.shape_cast %121 : vector<1x1x128xf32> to vector<1x128xf32>
    %123 = vector.broadcast %122 : vector<1x128xf32> to vector<16x128xf32>
    %124 = arith.addf %120, %123 : vector<16x128xf32>
    %cst_82 = arith.constant 0.000000e+00 : f32
    %125 = vector.broadcast %cst_82 : f32 to vector<16x128xf32>
    %126 = arith.maximumf %124, %125 : vector<16x128xf32>
    %c8 = arith.constant 8 : index
    %c0_83 = arith.constant 0 : index
    %c0_84 = arith.constant 0 : index
    %127 = vector.load %arg2[%c8, %c0_83, %c0_84] : memref<9x32x128xbf16, #tpu.memory_space<vmem>>, vector<1x32x128xbf16>
    %128 = vector.shape_cast %127 : vector<1x32x128xbf16> to vector<32x128xbf16>
    %129 = arith.extf %128 : vector<32x128xbf16> to vector<32x128xf32>
    %130 = vector.extract_strided_slice %126 {offsets = [0, 0], sizes = [16, 32], strides = [1, 1]} : vector<16x128xf32> to vector<16x32xf32>
    %cst_85 = arith.constant dense<0.000000e+00> : vector<16x128xf32>
    %131 = tpu.matmul %130, %129, %cst_85 {dimension_numbers = #tpu.dot_dimension_numbers<[1], [0], [0], [1], [0, 0, 1, 1], [], []>} : vector<16x32xf32>, vector<32x128xf32>, vector<16x128xf32> -> vector<16x128xf32>
    %c8_86 = arith.constant 8 : index
    %c0_87 = arith.constant 0 : index
    %c0_88 = arith.constant 0 : index
    %132 = vector.load %arg3[%c8_86, %c0_87, %c0_88] : memref<9x1x128xf32, #tpu.memory_space<vmem>>, vector<1x1x128xf32>
    %133 = vector.shape_cast %132 : vector<1x1x128xf32> to vector<1x128xf32>
    %134 = vector.broadcast %133 : vector<1x128xf32> to vector<16x128xf32>
    %135 = arith.addf %131, %134 : vector<16x128xf32>
    %cst_89 = arith.constant 0.000000e+00 : f32
    %136 = vector.broadcast %cst_89 : f32 to vector<16x128xf32>
    %137 = arith.subf %136, %135 : vector<16x128xf32>
    %138 = math.exp %137 : vector<16x128xf32>
    %cst_90 = arith.constant 1.000000e+00 : f32
    %139 = vector.broadcast %cst_90 : f32 to vector<16x128xf32>
    %140 = arith.addf %139, %138 : vector<16x128xf32>
    %cst_91 = arith.constant 1.000000e+00 : f32
    %141 = vector.broadcast %cst_91 : f32 to vector<16x128xf32>
    %142 = arith.divf %141, %140 : vector<16x128xf32>
    %c0_92 = arith.constant 0 : index
    %c0_93 = arith.constant 0 : index
    %143 = vector.load %arg4[%c0_92, %c0_93] : memref<16x128xf32, #tpu.memory_space<vmem>>, vector<16x128xf32>
    tpu.vector_store %arg4[%c0_92, %c0_93], %71 {strides = array<i32>} : memref<16x128xf32, #tpu.memory_space<vmem>>, vector<16x128xf32>,
    %c0_94 = arith.constant 0 : index
    %c0_95 = arith.constant 0 : index
    %144 = vector.load %arg5[%c0_94, %c0_95] : memref<16x128xf32, #tpu.memory_space<vmem>>, vector<16x128xf32>
    tpu.vector_store %arg5[%c0_94, %c0_95], %142 {strides = array<i32>} : memref<16x128xf32, #tpu.memory_space<vmem>>, vector<16x128xf32>,
    return
  }
  func.func @transform_0(%arg0: i32) -> (i32, i32) {
    %c0_i32 = arith.constant 0 : i32
    %c0_i32_0 = arith.constant 0 : i32
    return %arg0, %c0_i32 : i32, i32
  }
  func.func @transform_1(%arg0: i32) -> (i32, i32, i32) {
    %c0_i32 = arith.constant 0 : i32
    %c0_i32_0 = arith.constant 0 : i32
    %c0_i32_1 = arith.constant 0 : i32
    %c0_i32_2 = arith.constant 0 : i32
    return %c0_i32, %c0_i32_0, %c0_i32_1 : i32, i32, i32
  }
  func.func @transform_2(%arg0: i32) -> (i32, i32, i32) {
    %c0_i32 = arith.constant 0 : i32
    %c0_i32_0 = arith.constant 0 : i32
    %c0_i32_1 = arith.constant 0 : i32
    %c0_i32_2 = arith.constant 0 : i32
    return %c0_i32, %c0_i32_0, %c0_i32_1 : i32, i32, i32
  }
  func.func @transform_3(%arg0: i32) -> (i32, i32) {
    %c0_i32 = arith.constant 0 : i32
    %c0_i32_0 = arith.constant 0 : i32
    return %arg0, %c0_i32 : i32, i32
  }
  func.func @transform_4(%arg0: i32) -> (i32, i32) {
    %c0_i32 = arith.constant 0 : i32
    %c0_i32_0 = arith.constant 0 : i32
    return %arg0, %c0_i32 : i32, i32
  }
}

</mosaic_0001>

<bundles_post_ra>
// kernel: _lambda_.1
= control target key start
LH: loop header
LB: loop body
LE: loop exit
PB: predicated region body
PF: predicated region fallthrough
CT: control target
= control target key end

     0   :  { %vm34_vm0 = vcmask 261120   ;;  %s1856_s0 = inlined_call_operand.vmem [shape: f32[16,128], index: 0, kind: input, shape index: {}]   ;;  %s1857_s1 = inlined_call_operand.vmem [shape: bf16[9,32,128], index: 1, kind: input, shape index: {}]   ;;  %s1858_s2 = inlined_call_operand.vmem [shape: f32[9,1,128], index: 2, kind: input, shape index: {}]   ;;  %s1859_s3 = inlined_call_operand.vmem [shape: f32[16,128], index: 3, kind: output, shape index: {0}]   ;;  %s1860_s4 = inlined_call_operand.hbm [shape: f32[16,128], index: 4, kind: output, shape index: {1}]  }
   0x1   :  { %v1356_v0 = vld [vmem:[%s1857_s1 + $0x8] sm:$0xff]   ;;  %v1285_v1 = vld [vmem:[%s1857_s1] sm:$0xff]  }
   0x2   :  { %v17_v2 = vld [vmem:[%s1856_s0] sm:$0xff]  ;;  %v1655_v3 = vunpack.c.h.bf16 %v1356_v0  ;;  %v1657_v4 = vunpack.c.l.bf16 %v1356_v0 }
   0x3   :  { %1453 = vmatprep.mubr.msk.f32.mxu0 %vm34_vm0, %v17_v2 }
   0x4   :  { %10 = vsyncpa [#allocation3], 0  ;;  %1445 = vmatprep.subr.mxu0 %v1655_v3  ;;  %v1661_v5 = vunpack.c.h.bf16 %v1285_v1  ;;  %v1665_v6 = vunpack.c.l.bf16 %v1285_v1  ;;  %v18_v7 = vld [vmem:[%s1856_s0 + $0x8] sm:$0xff]  ;;  %v1358_v8 = vld [vmem:[%s1857_s1 + $0x18] sm:$0xff]   ;;  %s1618_s21 = smov [#allocation2]  }
   0x5   :  { %1446 = vmatpush3.msra.mxu0 %v1655_v3  ;;  %v1679_v9 = vunpack.c.h.bf16 %v1358_v8  ;;  %v1682_v10 = vunpack.c.l.bf16 %v1358_v8  ;;  %v1357_v11 = vld [vmem:[%s1857_s1 + $0x10] sm:$0xff]   ;;  %v1701_v14 = vld [vmem:[%s1858_s2] ss:$0 sm:$0xff]  ;;  %v1360_v21 = vld [vmem:[%s1857_s1 + $0x28] sm:$0xff]   ;;  %s1198_s22 = sshll.u32 %s1618_s21, 4  ;;  %s1199_s22 = int_to_ptr.vmem [resolvable:$true] %s1198_s22 }
   0x6   :  { %1447 = vmatprep.subr.mxu0 %v1657_v4  ;;  %v1689_v12 = vunpack.c.h.bf16 %v1357_v11  ;;  %v1693_v13 = vunpack.c.l.bf16 %v1357_v11  ;;  %v1710_v22 = vunpack.c.h.bf16 %v1360_v21  ;;  %v1713_v23 = vunpack.c.l.bf16 %v1360_v21  ;;  %v1359_v24 = vld [vmem:[%s1857_s1 + $0x20] sm:$0xff]   ;;  %v1362_v34 = vld [vmem:[%s1857_s1 + $0x38] sm:$0xff]   ;;  %v1361_v37 = vld [vmem:[%s1857_s1 + $0x30] sm:$0xff]   ;;  %p1601_p1 = scmp.lt.s32.totalorder %s1199_s22, %s1199_s22 }
   0x7   :  { %1448 = vmatpush3.msra.mxu0 %v1657_v4  ;;  %1456 = vmatprep.subr.mxu1 %v1679_v9  ;;  %v1720_v25 = vunpack.c.h.bf16 %v1359_v24  ;;  %v1724_v26 = vunpack.c.l.bf16 %v1359_v24  ;;  %v1732_v27 = vld [vmem:[%s1858_s2 + $0x1] ss:$0 sm:$0xff]  ;;  %v1315_v35 = vunpack.c.h.bf16 %v1362_v34  ;;  %v1314_v36 = vunpack.c.l.bf16 %v1362_v34  ;;  %v1747_v40 = vld [vmem:[%s1858_s2 + $0x2] ss:$0 sm:$0xff]  ;;  %v1364_v47 = vld [vmem:[%s1857_s1 + $0x48] sm:$0xff]  }
   0x8   :  { %1449 = vmatprep.subr.mxu0 %v1661_v5  ;;  %1457 = vmatpush3.msra.mxu1 %v1679_v9  ;;  %v1311_v38 = vunpack.c.h.bf16 %v1361_v37  ;;  %v1310_v39 = vunpack.c.l.bf16 %v1361_v37  ;;  %v1323_v48 = vunpack.c.h.bf16 %v1364_v47  ;;  %v1322_v49 = vunpack.c.l.bf16 %v1364_v47  ;;  %v1363_v50 = vld [vmem:[%s1857_s1 + $0x40] sm:$0xff]   ;;  %v1366_v60 = vld [vmem:[%s1857_s1 + $0x58] sm:$0xff]   ;;  %v1365_v63 = vld [vmem:[%s1857_s1 + $0x50] sm:$0xff]  }
   0x9   :  { %1450 = vmatpush3.msra.mxu0 %v1661_v5  ;;  %1458 = vmatprep.subr.mxu1 %v1682_v10  ;;  %v1319_v51 = vunpack.c.h.bf16 %v1363_v50  ;;  %v1318_v52 = vunpack.c.l.bf16 %v1363_v50  ;;  %v1235_v53 = vld [vmem:[%s1858_s2 + $0x3] ss:$0 sm:$0xff]  ;;  %v1331_v61 = vunpack.c.h.bf16 %v1366_v60  ;;  %v1330_v62 = vunpack.c.l.bf16 %v1366_v60  ;;  %v1243_v2 = vld [vmem:[%s1858_s2 + $0x4] ss:$0 sm:$0xff]  ;;  %v1251_v11 = vld [vmem:[%s1858_s2 + $0x5] ss:$0 sm:$0xff] }
   0xa   :  { %1451 = vmatprep.subr.mxu0 %v1665_v6  ;;  %1459 = vmatpush3.msra.mxu1 %v1682_v10  ;;  %v1327_v0 = vunpack.c.h.bf16 %v1365_v63  ;;  %v1326_v1 = vunpack.c.l.bf16 %v1365_v63 }
   0xb   :  { %1452 = vmatpush3.msra.mxu0 %v1665_v6  ;;  %1460 = vmatprep.subr.mxu1 %v1689_v12 }
   0xc   :  { %1454 = vmatmul.mubr.msk.f32.vlgmr.msra.gmra.mxu0 %vm34_vm0, %v18_v7  ;;  %1461 = vmatpush3.msra.mxu1 %v1689_v12 }
   0xd   :  { %1462 = vmatprep.subr.mxu1 %v1693_v13  ;;  %1467 = vmatprep.subr.mxu0 %v1710_v22 }
   0xe   :  { %1463 = vmatpush3.msra.mxu1 %v1693_v13  ;;  %1468 = vmatpush3.msra.mxu0 %v1710_v22 }
   0xf   :  { %1469 = vmatprep.subr.mxu0 %v1713_v23  ;;  %1478 = vmatprep.subr.mxu1 %v1315_v35 }
  0x10   :  { %1470 = vmatpush3.msra.mxu0 %v1713_v23 }
  0x11   :  { %1471 = vmatprep.subr.mxu0 %v1720_v25 }
  0x12   :  { %1472 = vmatpush3.msra.mxu0 %v1720_v25 }
  0x13   :  { %1473 = vmatprep.subr.mxu0 %v1724_v26 }
  0x14   :  { %1474 = vmatpush3.msra.mxu0 %v1724_v26 }
  0x15   :  { %1489 = vmatprep.subr.mxu0 %v1323_v48 }
  0xcc   :  { %v1455_v15 = vpop.f32.mrf.mxu0 }
  0xcd   :  { %v113_v16 = vadd.f32 %v1455_v15, %v1701_v14 }
  0xce   :  { %v107_v17 = vpop.f32.mrf.mxu0 }
  0xcf   :  { %v108_v18 = vadd.f32 %v1701_v14, %v107_v17  ;;  %v117_v20 = vmax.f32 %v113_v16, 0.0 }
  0xd1   :  { %v116_v19 = vmax.f32 %v108_v18, 0.0 }
  0xd3   :  { %1464 = vmatprep.mubr.msk.f32.mxu1 %vm34_vm0, %v116_v19 }
  0xd4   :  { %1465 = vmatmul.mubr.msk.f32.vlgmr.msra.gmra.mxu1 %vm34_vm0, %v117_v20 }
  0xd5   :  { %1479 = vmatpush3.msra.mxu1 %v1315_v35 }
  0xd6   :  { %1480 = vmatprep.subr.mxu1 %v1314_v36 }
  0xd7   :  { %1481 = vmatpush3.msra.mxu1 %v1314_v36 }
  0xd8   :  { %1482 = vmatprep.subr.mxu1 %v1311_v38 }
  0xd9   :  { %1483 = vmatpush3.msra.mxu1 %v1311_v38 }
  0xda   :  { %1484 = vmatprep.subr.mxu1 %v1310_v39 }
  0xdb   :  { %1485 = vmatpush3.msra.mxu1 %v1310_v39 }
  0xdc   :  { %1500 = vmatprep.subr.mxu1 %v1331_v61 }
 0x194   :  { %v1466_v28 = vpop.f32.mrf.mxu1 }
 0x195   :  { %v213_v29 = vadd.f32 %v1466_v28, %v1732_v27 }
 0x196   :  { %v207_v30 = vpop.f32.mrf.mxu1 }
 0x197   :  { %v208_v31 = vadd.f32 %v1732_v27, %v207_v30  ;;  %v217_v33 = vmax.f32 %v213_v29, 0.0 }
 0x199   :  { %v216_v32 = vmax.f32 %v208_v31, 0.0 }
 0x19b   :  { %1475 = vmatprep.mubr.msk.f32.mxu0 %vm34_vm0, %v216_v32 }
 0x19c   :  { %1476 = vmatmul.mubr.msk.f32.vlgmr.msra.gmra.mxu0 %vm34_vm0, %v217_v33 }
 0x19d   :  { %1490 = vmatpush3.msra.mxu0 %v1323_v48 }
 0x19e   :  { %1491 = vmatprep.subr.mxu0 %v1322_v49 }
 0x19f   :  { %1492 = vmatpush3.msra.mxu0 %v1322_v49  ;;  %v1370_v49 = vld [vmem:[%s1857_s1 + $0x78] sm:$0xff]  }
 0x1a0   :  { %1493 = vmatprep.subr.mxu0 %v1319_v51  ;;  %v1347_v50 = vunpack.c.h.bf16 %v1370_v49 }
 0x1a1   :  { %1494 = vmatpush3.msra.mxu0 %v1319_v51  ;;  %v1346_v51 = vunpack.c.l.bf16 %v1370_v49 }
 0x1a2   :  { %1495 = vmatprep.subr.mxu0 %v1318_v52 }
 0x1a3   :  { %1496 = vmatpush3.msra.mxu0 %v1318_v52  ;;  %v1369_v52 = vld [vmem:[%s1857_s1 + $0x70] sm:$0xff]  }
 0x1a4   :  { %1511 = vmatprep.subr.mxu0 %v1655_v3 }
 0x25c   :  { %v1477_v41 = vpop.f32.mrf.mxu0 }
 0x25d   :  { %v313_v42 = vadd.f32 %v1477_v41, %v1747_v40  ;;  %v1367_v41 = vld [vmem:[%s1857_s1 + $0x60] sm:$0xff]  }
 0x25e   :  { %v307_v43 = vpop.f32.mrf.mxu0 }
 0x25f   :  { %v308_v44 = vadd.f32 %v1747_v40, %v307_v43  ;;  %v317_v46 = vmax.f32 %v313_v42, 0.0  ;;  %v1334_v42 = vunpack.c.l.bf16 %v1367_v41 }
 0x261   :  { %v316_v45 = vmax.f32 %v308_v44, 0.0 }
 0x263   :  { %1486 = vmatprep.mubr.msk.f32.mxu1 %vm34_vm0, %v316_v45 }
 0x264   :  { %1487 = vmatmul.mubr.msk.f32.vlgmr.msra.gmra.mxu1 %vm34_vm0, %v317_v46 }
 0x265   :  { %1501 = vmatpush3.msra.mxu1 %v1331_v61  ;;  %v1372_v61 = vld [vmem:[%s1857_s1 + $0x88] sm:$0xff]  }
 0x266   :  { %1502 = vmatprep.subr.mxu1 %v1330_v62  ;;  %v1354_v63 = vunpack.c.l.bf16 %v1372_v61 }
 0x267   :  { %1503 = vmatpush3.msra.mxu1 %v1330_v62  ;;  %v1355_v62 = vunpack.c.h.bf16 %v1372_v61 }
 0x268   :  { %1504 = vmatprep.subr.mxu1 %v1327_v0 }
 0x269   :  { %1505 = vmatpush3.msra.mxu1 %v1327_v0  ;;  %v1371_v0 = vld [vmem:[%s1857_s1 + $0x80] sm:$0xff]  }
 0x26a   :  { %1506 = vmatprep.subr.mxu1 %v1326_v1 }
 0x26b   :  { %1507 = vmatpush3.msra.mxu1 %v1326_v1  ;;  %v1351_v1 = vunpack.c.h.bf16 %v1371_v0 }
 0x26c   :  { %1522 = vmatprep.subr.mxu1 %v1679_v9 }
 0x324   :  { %v1488_v54 = vpop.f32.mrf.mxu1 }
 0x325   :  { %v413_v55 = vadd.f32 %v1488_v54, %v1235_v53  ;;  %v1265_v54 = vld [vmem:[%s1858_s2 + $0x6] ss:$0 sm:$0xff] }
 0x326   :  { %v407_v56 = vpop.f32.mrf.mxu1 }
 0x327   :  { %v408_v57 = vadd.f32 %v1235_v53, %v407_v56  ;;  %v417_v59 = vmax.f32 %v413_v55, 0.0  ;;  %v1342_v53 = vunpack.c.l.bf16 %v1369_v52 }
 0x329   :  { %v416_v58 = vmax.f32 %v408_v57, 0.0 }
 0x32b   :  { %1497 = vmatprep.mubr.msk.f32.mxu0 %vm34_vm0, %v416_v58 }
 0x32c   :  { %1498 = vmatmul.mubr.msk.f32.vlgmr.msra.gmra.mxu0 %vm34_vm0, %v417_v59 }
 0x32d   :  { %1512 = vmatpush3.msra.mxu0 %v1655_v3 }
 0x32e   :  { %1513 = vmatprep.subr.mxu0 %v1657_v4 }
 0x32f   :  { %1514 = vmatpush3.msra.mxu0 %v1657_v4 }
 0x330   :  { %1515 = vmatprep.subr.mxu0 %v1661_v5 }
 0x331   :  { %1516 = vmatpush3.msra.mxu0 %v1661_v5 }
 0x332   :  { %1517 = vmatprep.subr.mxu0 %v1665_v6 }
 0x333   :  { %1518 = vmatpush3.msra.mxu0 %v1665_v6 }
 0x334   :  { %1533 = vmatprep.subr.mxu0 %v1710_v22 }
 0x3ec   :  { %v1499_v3 = vpop.f32.mrf.mxu0 }
 0x3ed   :  { %v513_v4 = vadd.f32 %v1499_v3, %v1243_v2  ;;  %v1273_v3 = vld [vmem:[%s1858_s2 + $0x7] ss:$0 sm:$0xff] }
 0x3ee   :  { %v507_v5 = vpop.f32.mrf.mxu0 }
 0x3ef   :  { %v508_v6 = vadd.f32 %v1243_v2, %v507_v5  ;;  %v517_v8 = vmax.f32 %v513_v4, 0.0  ;;  %v1350_v2 = vunpack.c.l.bf16 %v1371_v0 }
 0x3f1   :  { %v516_v7 = vmax.f32 %v508_v6, 0.0 }
 0x3f3   :  { %1508 = vmatprep.mubr.msk.f32.mxu1 %vm34_vm0, %v516_v7 }
 0x3f4   :  { %1509 = vmatmul.mubr.msk.f32.vlgmr.msra.gmra.mxu1 %vm34_vm0, %v517_v8 }
 0x3f5   :  { %1523 = vmatpush3.msra.mxu1 %v1679_v9 }
 0x3f6   :  { %1524 = vmatprep.subr.mxu1 %v1682_v10 }
 0x3f7   :  { %1525 = vmatpush3.msra.mxu1 %v1682_v10 }
 0x3f8   :  { %1526 = vmatprep.subr.mxu1 %v1689_v12 }
 0x3f9   :  { %1527 = vmatpush3.msra.mxu1 %v1689_v12 }
 0x3fa   :  { %1528 = vmatprep.subr.mxu1 %v1693_v13 }
 0x3fb   :  { %1529 = vmatpush3.msra.mxu1 %v1693_v13 }
 0x4b4   :  { %v1510_v15 = vpop.f32.mrf.mxu1 }
 0x4b5   :  { %v613_v16 = vadd.f32 %v1510_v15, %v1251_v11  ;;  %v1281_v15 = vld [vmem:[%s1858_s2 + $0x8] ss:$0 sm:$0xff]  ;;  %s1596_s2 = scalar_lea.vmem %s1199_s22, 256 }
 0x4b6   :  { %v607_v17 = vpop.f32.mrf.mxu1  ;;  %p1597_p0 = scmp.ne.s32.totalorder %s1199_s22, %s1596_s2  ;;  %p1602_p2 = scmp.lt.s32.totalorder %s1596_s2, %s1596_s2 }
 0x4b7   :  { %v617_v9 = vsub.f32 0.0, %v613_v16  ;;  %v608_v18 = vadd.f32 %v1251_v11, %v607_v17 }
 0x4b8   :  { %p1603_p3 = por %p1602_p2, %p1601_p1 }
 0x4b9   :  { %v620_v19 = vmul.f32 1.442695, %v617_v9  ;;  %v616_v20 = vsub.f32 0.0, %v608_v18 }
 0x4ba   :  { %p1604_p4 = pnand %p1603_p3, %p1597_p0 }
 0x4bb   :  { %1580 = vpow2.f32 %v620_v19  ;;  %v618_v10 = vmul.f32 1.442695, %v616_v20 }
 0x4bd   :  { %1582 = vpow2.f32 %v618_v10 }
 0x4c8   :  { %v1581_v21 = vpop.eup %1580 }
 0x4c9   :  { %v623_v12 = vadd.f32 1.0, %v1581_v21 }
 0x4ca   :  { %v1583_v24 = vpop.eup %1582 }
 0x4cb   :  { %1584 = vrcp.f32 %v623_v12  ;;  %v622_v28 = vadd.f32 1.0, %v1583_v24 }
 0x4cd   :  { %1586 = vrcp.f32 %v622_v28 }
 0x4d8   :  { %v1585_v13 = vpop.eup %1584 }
 0x4d9   :  { %1188 = vst [vmem:[%s1859_s3 + $0x8] sm:$0xff] %v1585_v13 }
 0x4da   :  { %v1587_v29 = vpop.eup %1586 }
 0x4db   :  { %1187 = vst [vmem:[%s1859_s3] sm:$0xff] %v1587_v29  ;;  %1519 = vmatprep.mubr.msk.f32.mxu0 %vm34_vm0, %v1587_v29 }
 0x4dc   :  { %1520 = vmatmul.mubr.msk.f32.vlgmr.msra.gmra.mxu0 %vm34_vm0, %v1585_v13 }
 0x4dd   :  { %1534 = vmatpush3.msra.mxu0 %v1710_v22 }
 0x4de   :  { %1535 = vmatprep.subr.mxu0 %v1713_v23 }
 0x4df   :  { %1536 = vmatpush3.msra.mxu0 %v1713_v23 }
 0x4e0   :  { %1537 = vmatprep.subr.mxu0 %v1720_v25 }
 0x4e1   :  { %1538 = vmatpush3.msra.mxu0 %v1720_v25 }
 0x4e2   :  { %1539 = vmatprep.subr.mxu0 %v1724_v26 }
 0x4e3   :  { %1540 = vmatpush3.msra.mxu0 %v1724_v26 }
 0x4e4   :  { %1555 = vmatprep.subr.mxu0 %v1347_v50 }
 0x59c   :  { %v1521_v30 = vpop.f32.mrf.mxu0 }
 0x59d   :  { %v706_v31 = vadd.f32 %v1521_v30, %v1701_v14 }
 0x59e   :  { %v700_v32 = vpop.f32.mrf.mxu0 }
 0x59f   :  { %v701_v33 = vadd.f32 %v1701_v14, %v700_v32  ;;  %v710_v22 = vmax.f32 %v706_v31, 0.0  ;;  %v1368_v14 = vld [vmem:[%s1857_s1 + $0x68] sm:$0xff]  }
 0x5a0   :  { %v1339_v38 = vunpack.c.h.bf16 %v1368_v14  ;;  %v1338_v39 = vunpack.c.l.bf16 %v1368_v14 }
 0x5a1   :  { %v709_v34 = vmax.f32 %v701_v33, 0.0 }
 0x5a2   :  { %1544 = vmatprep.subr.mxu1 %v1339_v38 }
 0x5a3   :  { %1530 = vmatprep.mubr.msk.f32.mxu1 %vm34_vm0, %v709_v34 }
 0x5a4   :  { %1531 = vmatmul.mubr.msk.f32.vlgmr.msra.gmra.mxu1 %vm34_vm0, %v710_v22 }
 0x5a5   :  { %1545 = vmatpush3.msra.mxu1 %v1339_v38 }
 0x5a6   :  { %1546 = vmatprep.subr.mxu1 %v1338_v39 }
 0x5a7   :  { %1547 = vmatpush3.msra.mxu1 %v1338_v39 }
 0x664   :  { %v1532_v23 = vpop.f32.mrf.mxu1 }
 0x665   :  { %v789_v35 = vadd.f32 %v1532_v23, %v1732_v27 }
 0x666   :  { %v783_v25 = vpop.f32.mrf.mxu1 }
 0x667   :  { %v784_v36 = vadd.f32 %v1732_v27, %v783_v25  ;;  %v793_v26 = vmax.f32 %v789_v35, 0.0  ;;  %v1335_v27 = vunpack.c.h.bf16 %v1367_v41 }
 0x669   :  { %v792_v37 = vmax.f32 %v784_v36, 0.0  ;;  %1548 = vmatprep.subr.mxu1 %v1335_v27 }
 0x66a   :  { %1549 = vmatpush3.msra.mxu1 %v1335_v27 }
 0x66b   :  { %1541 = vmatprep.mubr.msk.f32.mxu0 %vm34_vm0, %v792_v37  ;;  %1550 = vmatprep.subr.mxu1 %v1334_v42 }
 0x66c   :  { %1542 = vmatmul.mubr.msk.f32.vlgmr.msra.gmra.mxu0 %vm34_vm0, %v793_v26  ;;  %1551 = vmatpush3.msra.mxu1 %v1334_v42 }
 0x66d   :  { %1556 = vmatpush3.msra.mxu0 %v1347_v50  ;;  %1566 = vmatprep.subr.mxu1 %v1355_v62 }
 0x66e   :  { %1557 = vmatprep.subr.mxu0 %v1346_v51 }
 0x66f   :  { %1558 = vmatpush3.msra.mxu0 %v1346_v51 }
 0x72c   :  { %v1543_v43 = vpop.f32.mrf.mxu0 }
 0x72d   :  { %v872_v44 = vadd.f32 %v1543_v43, %v1747_v40 }
 0x72e   :  { %v866_v45 = vpop.f32.mrf.mxu0 }
 0x72f   :  { %v867_v46 = vadd.f32 %v1747_v40, %v866_v45  ;;  %v876_v48 = vmax.f32 %v872_v44, 0.0  ;;  %v1343_v40 = vunpack.c.h.bf16 %v1369_v52 }
 0x731   :  { %v875_v47 = vmax.f32 %v867_v46, 0.0  ;;  %1559 = vmatprep.subr.mxu0 %v1343_v40 }
 0x732   :  { %1560 = vmatpush3.msra.mxu0 %v1343_v40 }
 0x733   :  { %1552 = vmatprep.mubr.msk.f32.mxu1 %vm34_vm0, %v875_v47  ;;  %1561 = vmatprep.subr.mxu0 %v1342_v53 }
 0x734   :  { %1553 = vmatmul.mubr.msk.f32.vlgmr.msra.gmra.mxu1 %vm34_vm0, %v876_v48  ;;  %1562 = vmatpush3.msra.mxu0 %v1342_v53 }
 0x735   :  { %1567 = vmatpush3.msra.mxu1 %v1355_v62 }
 0x736   :  { %1568 = vmatprep.subr.mxu1 %v1354_v63 }
 0x737   :  { %1569 = vmatpush3.msra.mxu1 %v1354_v63 }
 0x738   :  { %1570 = vmatprep.subr.mxu1 %v1351_v1 }
 0x739   :  { %1571 = vmatpush3.msra.mxu1 %v1351_v1 }
 0x73a   :  { %1572 = vmatprep.subr.mxu1 %v1350_v2 }
 0x73b   :  { %1573 = vmatpush3.msra.mxu1 %v1350_v2 }
 0x7f4   :  { %v1554_v55 = vpop.f32.mrf.mxu1 }
 0x7f5   :  { %v972_v56 = vadd.f32 %v1554_v55, %v1265_v54 }
 0x7f6   :  { %v966_v57 = vpop.f32.mrf.mxu1 }
 0x7f7   :  { %v967_v58 = vadd.f32 %v1265_v54, %v966_v57  ;;  %v976_v60 = vmax.f32 %v972_v56, 0.0 }
 0x7f9   :  { %v975_v59 = vmax.f32 %v967_v58, 0.0 }
 0x7fb   :  { %1563 = vmatprep.mubr.msk.f32.mxu0 %vm34_vm0, %v975_v59 }
 0x7fc   :  { %1564 = vmatmul.mubr.msk.f32.vlgmr.msra.gmra.mxu0 %vm34_vm0, %v976_v60 }
 0x8bc   :  { %v1565_v4 = vpop.f32.mrf.mxu0 }
 0x8bd   :  { %v1072_v5 = vadd.f32 %v1565_v4, %v1273_v3 }
 0x8be   :  { %v1066_v6 = vpop.f32.mrf.mxu0 }
 0x8bf   :  { %v1067_v7 = vadd.f32 %v1273_v3, %v1066_v6  ;;  %v1076_v11 = vmax.f32 %v1072_v5, 0.0 }
 0x8c1   :  { %v1075_v8 = vmax.f32 %v1067_v7, 0.0 }
 0x8c3   :  { %1574 = vmatprep.mubr.msk.f32.mxu1 %vm34_vm0, %v1075_v8 }
 0x8c4   :  { %1575 = vmatmul.mubr.msk.f32.vlgmr.msra.gmra.mxu1 %vm34_vm0, %v1076_v11 }
 0x984   :  { %v1576_v16 = vpop.f32.mrf.mxu1 }
 0x985   :  { %v1172_v17 = vadd.f32 %v1576_v16, %v1281_v15 }
 0x986   :  { %v1166_v9 = vpop.f32.mrf.mxu1 }
 0x987   :  { %v1176_v18 = vsub.f32 0.0, %v1172_v17  ;;  %v1167_v19 = vadd.f32 %v1281_v15, %v1166_v9 }
 0x989   :  { %v1179_v20 = vmul.f32 1.442695, %v1176_v18  ;;  %v1175_v10 = vsub.f32 0.0, %v1167_v19 }
 0x98b   :  { %1588 = vpow2.f32 %v1179_v20  ;;  %v1177_v21 = vmul.f32 1.442695, %v1175_v10 }
 0x98d   :  { %1590 = vpow2.f32 %v1177_v21 }
 0x998   :  { %v1589_v12 = vpop.eup %1588 }
 0x999   :  { %v1182_v24 = vadd.f32 1.0, %v1589_v12 }
 0x99a   :  { %v1591_v28 = vpop.eup %1590 }
 0x99b   :  { %1592 = vrcp.f32 %v1182_v24  ;;  %v1181_v13 = vadd.f32 1.0, %v1591_v28 }
 0x99d   :  { %1594 = vrcp.f32 %v1181_v13 }
 0x9a8   :  { %v1593_v29 = vpop.eup %1592 }
 0x9a9   :  { %1190 = vst [vmem:[#allocation2 + $0x8] sm:$0xff] %v1593_v29 }
 0x9aa   :  { %v1595_v30 = vpop.eup %1594 }
 0x9ab   :  { %1189 = vst [vmem:[#allocation2] sm:$0xff] %v1595_v30 }
 0x9ac   :  { %1607 = shalt.err (!%p1604_p4)
}
 0x9ad   :  { %s1619_s23 = smov 128   ;;  %s1620_s24 = smov 8  }
 0x9ae   :  { %1204 = dma.vmem_to_hbm [thread:$0]  %s1199_s22, 256, %s1860_s4, [#allocation3], %s1619_s23, %s1619_s23, %s1620_s24  }
 0x9af   :  { %1616 = dma.done.wait [#allocation3], 256  }
 0x9b0   :  { %1617 = vsyncadd [#allocation3], 4294967040 }
 0x9b1   :  { %1210 = vsyncpa [#allocation3], 1 }

</bundles_post_ra>
